<compile_context>
chip_gen: v7x
topology: tpu7x:2x2x1
jax: 0.10.0
libtpu: 0.0.40
codegen_flags: <defaults>
</compile_context>

<pallas_src>
import math
import functools

import numpy as np
import jax
import jax.numpy as jnp
from jax.experimental import pallas as pl
from jax.experimental.pallas import tpu as pltpu


_MAX_TILE_BYTES = 2 * 1024 * 1024   # per output tile; keep <= 8 MiB so the
                                    # double-buffered pair fits every generation
                                    # (incl. v7x's 64 MiB physical VMEM).


def _round_up(x, m):
    return ((x + m - 1) // m) * m


def _cdiv(a, b):
    return -(-a // b)


def _num_tensorcores():
    """Best-effort TensorCores-per-chip (megacore) detection; perf-only."""
    try:
        kind = (jax.devices()[0].device_kind or "").lower()
    except Exception:
        return 1
    if "v4" in kind or "v7" in kind:
        return 2
    return 1


def _pe_kernel(tab_ref, o_ref, *, block_r):
    """One (block_r, block_c) lane-dense tile of the sinusoidal PE table.

    tab_ref[0, l] = step[l]  (angle increment per output row for lane l)
    tab_ref[1, l] = base[l]  (angle at row 0 for lane l; includes the pi/2
                              phase that turns sin into cos on odd features)
    o[r, l] = sin((i*block_r + r) * step[l] + base[l])
    """
    i = pl.program_id(0)
    row = jax.lax.broadcasted_iota(jnp.int32, o_ref.shape, 0)
    r = (i * block_r + row).astype(jnp.float32)
    o_ref[...] = jnp.sin(r * tab_ref[0:1, :] + tab_ref[1:2, :])


@functools.lru_cache(maxsize=None)
def _pe_table(seq_len, d_model):
    """Build pe[:, :seq_len] once per (seq_len, d_model); shape (1, seq_len, d_model)."""
    assert d_model % 2 == 0, "d_model must be even (as in the PyTorch module)"
    log_term = -math.log(10000.0) / d_model

    if 128 % d_model == 0:
        # Lane-dense fold: 512 // d_model consecutive positions per 512-lane row.
        k = 512 // d_model
        block_c = c_total = 512
        lane = np.arange(512)
        feat = lane % d_model
        pos_off = (lane // d_model).astype(np.float64)
        n_rows = _cdiv(seq_len, k)
    else:
        # Feature axis padded only to a multiple of 128; block_c divides c_total.
        k = 1
        c_total = _round_up(d_model, 128)
        block_c = max(c for c in (512, 384, 256, 128) if c_total % c == 0)
        lane = np.arange(c_total)
        feat = np.minimum(lane, d_model - 1)      # padding lanes sliced away below
        pos_off = np.zeros((c_total,), np.float64)
        n_rows = seq_len

    # Host-side (float64) lane tables, folded into step/base, packed into one array.
    inv_freq = np.exp(2.0 * (feat // 2).astype(np.float64) * log_term)
    phase = np.where(feat % 2 == 0, 0.0, math.pi / 2.0)
    tab = np.stack([k * inv_freq, pos_off * inv_freq + phase]).astype(np.float32)

    # Row tiling: largest balanced tiles under the VMEM budget (multiple of 8);
    # on megacore chips make the tile count a multiple of the TC count.
    if n_rows <= 8:
        block_r = n_rows                          # single block == full row extent
    else:
        max_rows = max(8, (_MAX_TILE_BYTES // (block_c * 4)) // 8 * 8)
        n_tiles = _cdiv(n_rows, max_rows)
        num_tc = _num_tensorcores()
        if num_tc > 1 and n_rows >= 8 * num_tc:
            n_tiles = _round_up(n_tiles, num_tc)
        block_r = _round_up(_cdiv(n_rows, n_tiles), 8)
        block_r = max(8, min(block_r, (n_rows // 8) * 8))

    grid = (_cdiv(n_rows, block_r), c_total // block_c)

    pe = pl.pallas_call(
        functools.partial(_pe_kernel, block_r=block_r),
        out_shape=jax.ShapeDtypeStruct((n_rows, c_total), jnp.float32),
        grid_spec=pltpu.PrefetchScalarGridSpec(
            num_scalar_prefetch=0,
            grid=grid,
            in_specs=[pl.BlockSpec((2, block_c), lambda i, j: (0, j))],
            out_specs=pl.BlockSpec((block_r, block_c), lambda i, j: (i, j)),
        ),
        compiler_params=pltpu.CompilerParams(
            dimension_semantics=("parallel", "parallel"),
        ),
        cost_estimate=pl.CostEstimate(
            flops=3 * n_rows * c_total,
            transcendentals=n_rows * c_total,
            bytes_accessed=n_rows * c_total * 4 + tab.size * 4,
        ),
    )(jnp.asarray(tab))

    if k > 1:
        pe = pe.reshape(-1, d_model)              # contiguous unfold of folded positions
        if n_rows * k != seq_len:
            pe = pe[:seq_len]                     # only when seq_len % k != 0
    elif c_total != d_model:
        pe = pe[:, :d_model]                      # drop padded lanes (d_model % 128 != 0)
    return pe[None, :, :]                         # (1, seq_len, d_model)


def positional_embedding(x, d_model, max_len=5000):
    """JAX/Pallas equivalent of PositionalEmbedding.forward(x)."""
    seq_len = x.shape[2]
    assert seq_len <= max_len, "sequence length exceeds max_len"
    return _pe_table(int(seq_len), int(d_model))


def _reference_pe(seq_len, d_model):
    """Pure-JAX reference matching the PyTorch buffer construction."""
    position = jnp.arange(seq_len, dtype=jnp.float32)[:, None]
    div_term = jnp.exp(
        jnp.arange(0, d_model, 2, dtype=jnp.float32) * (-math.log(10000.0) / d_model)
    )
    ang = position * div_term
    pe = jnp.zeros((seq_len, d_model), jnp.float32)
    pe = pe.at[:, 0::2].set(jnp.sin(ang))
    pe = pe.at[:, 1::2].set(jnp.cos(ang))
    return pe[None]


if __name__ == "__main__":
    key = jax.random.PRNGKey(0)

    # NCHW-style input; only axis 2 (seq len = 16) is consumed by forward().
    d_model = 32
    x = jax.random.normal(key, (2, 4, 16, 16), dtype=jnp.float32)

    out = jax.block_until_ready(positional_embedding(x, d_model))
    ref = _reference_pe(x.shape[2], d_model)
    assert out.shape == (1, x.shape[2], d_model), out.shape
    assert out.dtype == jnp.float32
    assert jnp.allclose(out, ref, atol=1e-5, rtol=1e-5), "mismatch (d_model=32)"

    # Feature-tiled path, d_model a multiple of 128 (no lane padding, no slice).
    out2 = jax.block_until_ready(positional_embedding(x, 256))
    assert out2.shape == (1, x.shape[2], 256)
    assert jnp.allclose(out2, _reference_pe(x.shape[2], 256), atol=1e-5, rtol=1e-5), \
        "mismatch (d_model=256)"

    # Padded-lane path, d_model not a divisor / multiple of 128.
    out3 = jax.block_until_ready(positional_embedding(x, 96))
    assert out3.shape == (1, x.shape[2], 96)
    assert jnp.allclose(out3, _reference_pe(x.shape[2], 96), atol=1e-5, rtol=1e-5), \
        "mismatch (d_model=96)"

    # Ragged sequence length (seq_len not a multiple of the lane fold).
    x2 = jax.random.normal(key, (2, 4, 13, 16), dtype=jnp.float32)
    out4 = jax.block_until_ready(positional_embedding(x2, d_model))
    assert out4.shape == (1, 13, d_model)
    assert jnp.allclose(out4, _reference_pe(13, d_model), atol=1e-5, rtol=1e-5), \
        "mismatch (seq_len=13)"

    print("KERNEL_OK")
</pallas_src>

<mosaic_0001>
module attributes {stable_mosaic.version = 11 : i64} {
  func.func @_pe_kernel(%arg0: i32, %arg1: i32, %arg2: memref<2x512xf32, #tpu.memory_space<vmem>>, %arg3: memref<1x512xf32, #tpu.memory_space<vmem>>) attributes {dimension_semantics = [#tpu.dimension_semantics<parallel>, #tpu.dimension_semantics<parallel>], iteration_bounds = array<i64: 1, 1>, scalar_prefetch = 0 : i64, scratch_operands = 0 : i64, tpu.core_type = #tpu.core_type<tc>, window_params = [{transform_indices = @transform_0, window_bounds = array<i64: 2, 512>}, {transform_indices = @transform_1, window_bounds = array<i64: 1, 512>}]} {
    %0 = tpu.iota {dimensions = array<i32: 0>} : vector<1x512xi32>
    %c1_i32 = arith.constant 1 : i32
    %1 = arith.muli %arg0, %c1_i32 : i32
    %2 = vector.broadcast %1 : i32 to vector<1x512xi32>
    %3 = arith.addi %2, %0 : vector<1x512xi32>
    %4 = arith.sitofp %3 : vector<1x512xi32> to vector<1x512xf32>
    %c0 = arith.constant 0 : index
    %c0_0 = arith.constant 0 : index
    %5 = vector.load %arg2[%c0, %c0_0] : memref<2x512xf32, #tpu.memory_space<vmem>>, vector<1x512xf32>
    %6 = arith.mulf %4, %5 : vector<1x512xf32>
    %c1 = arith.constant 1 : index
    %c0_1 = arith.constant 0 : index
    %7 = vector.load %arg2[%c1, %c0_1] : memref<2x512xf32, #tpu.memory_space<vmem>>, vector<1x512xf32>
    %8 = arith.addf %6, %7 : vector<1x512xf32>
    %9 = math.sin %8 : vector<1x512xf32>
    %c0_2 = arith.constant 0 : index
    %c0_3 = arith.constant 0 : index
    %10 = vector.load %arg3[%c0_2, %c0_3] : memref<1x512xf32, #tpu.memory_space<vmem>>, vector<1x512xf32>
    tpu.vector_store %arg3[%c0_2, %c0_3], %9 {strides = array<i32>} : memref<1x512xf32, #tpu.memory_space<vmem>>, vector<1x512xf32>,
    return
  }
  func.func @transform_0(%arg0: i32, %arg1: i32) -> (i32, i32) {
    %c0_i32 = arith.constant 0 : i32
    %c0_i32_0 = arith.constant 0 : i32
    return %c0_i32, %arg1 : i32, i32
  }
  func.func @transform_1(%arg0: i32, %arg1: i32) -> (i32, i32) {
    %c0_i32 = arith.constant 0 : i32
    return %arg0, %arg1 : i32, i32
  }
}

</mosaic_0001>

<bundles_post_ra>
// kernel: tpu_custom_call.1
= control target key start
LH: loop header
LB: loop body
LE: loop exit
PB: predicated region body
PF: predicated region fallthrough
CT: control target
= control target key end

     0   :  { %6 = vsyncpa [#allocation3], 0  ;;  %s983_s0 = inlined_call_operand.hbm [shape: f32[2,512], index: 0, kind: input, shape index: {}]   ;;  %s984_s1 = inlined_call_operand.hbm [shape: f32[1,512], index: 1, kind: output, shape index: {}]  }
   0x1   :  { %7 = vsyncpa [#allocation4], 0  ;;  %s649_s6 = smov [#allocation2]   ;;  %s601_s10 = scalar_lea.hbm %s983_s0, 128 }
   0x2   :  { %s14_s7 = sshll.u32 %s649_s6, 4  ;;  %p602_p0 = scmp.ne.s32.totalorder %s983_s0, %s601_s10  ;;  %s15_s7 = int_to_ptr.vmem [resolvable:$true] %s14_s7 }
   0x3   :  { %p605_p1 = scmp.lt.u32.totalorder %s601_s10, %s983_s0 }
   0x5   :  { %p607_p2 = pnand %p605_p1, %p602_p0 }
   0x7   :  { %610 = shalt.err (!%p607_p2)
}
   0x8   :  { %s611_s15 = scalar_lea.vmem %s15_s7, 128  ;;  %p616_p4 = scmp.lt.s32.totalorder %s15_s7, %s15_s7 }
   0x9   :  { %p612_p3 = scmp.ne.s32.totalorder %s15_s7, %s611_s15  ;;  %p617_p5 = scmp.lt.s32.totalorder %s611_s15, %s611_s15 }
   0xb   :  { %p618_p6 = por %p617_p5, %p616_p4 }
   0xd   :  { %p619_p7 = pnand %p618_p6, %p612_p3 }
   0xf   :  { %622 = shalt.err (!%p619_p7)
}
  0x10   :  { %17 = dma.hbm_to_vmem [thread:$0]  %s983_s0, 128, %s15_s7, [#allocation3]  }
  0x11   :  { %645 = dma.done.wait [#allocation3], 128  }
  0x12   :  { %646 = vsyncadd [#allocation3], 4294967168  ;;  %v21_v0 = vlaneseq  ;;  %v26_v6 = vld [vmem:[#allocation2] ss:$2 sm:$0xf]  ;;  %s657_s0 = smov [#allocation5]  }
  0x13   :  { %v53_v7 = vld [vmem:[#allocation2 + $0x1] ss:$2 sm:$0xf]  ;;  %v650_v50 = vmov 683565275   ;;  %s535_s18 = sshll.u32 %s657_s0, 4  ;;  %s536_s18 = int_to_ptr.vmem [resolvable:$true] %s535_s18 }
  0x14   :  { %v681_v1 = vshrl.u32 %v21_v0, 7  ;;  %v651_v52 = vmov 2475754826   ;;  %v652_v54 = vmov 2131351028   ;;  %s623_s19 = scalar_lea.vmem %s536_s18, 64  ;;  %p628_p9 = scmp.lt.s32.totalorder %s536_s18, %s536_s18 }
  0x15   :  { %v653_v56 = vmov 2102212464   ;;  %v654_v58 = vmov 920167782   ;;  %p624_p8 = scmp.ne.s32.totalorder %s536_s18, %s623_s19  ;;  %p629_p10 = scmp.lt.s32.totalorder %s623_s19, %s623_s19 }
  0x16   :  { %v30_v2 = vsub.s32 0, %v681_v1  ;;  %v34_v3 = vsub.s32 1, %v681_v1  ;;  %v38_v4 = vsub.s32 2, %v681_v1  ;;  %v25_v5 = vcvt.s32.f32 %v681_v1 }
  0x17   :  { %v42_v24 = vsub.s32 3, %v681_v1  ;;  %p630_p11 = por %p629_p10, %p628_p9 }
  0x18   :  { %v31_v8 = vrot.slane %v26_v6, %v30_v2  ;;  %v35_v9 = vrot.slane %v26_v6, %v34_v3  ;;  %v39_v10 = vrot.slane %v26_v6, %v38_v4  ;;  %v58_v11 = vrot.slane %v53_v7, %v30_v2 }
  0x19   :  { %v62_v12 = vrot.slane %v53_v7, %v34_v3  ;;  %v66_v13 = vrot.slane %v53_v7, %v38_v4  ;;  %v43_v33 = vrot.slane %v26_v6, %v42_v24  ;;  %v703_v39 = vrot.slane %v53_v7, %v42_v24  ;;  %p631_p12 = pnand %p630_p11, %p624_p8 }
  0x1a   :  { %v48_v14 = vmul.f32 %v31_v8, %v25_v5  ;;  %v49_v15 = vmul.f32 %v35_v9, %v25_v5  ;;  %v50_v16 = vmul.f32 %v39_v10, %v25_v5  ;;  %v655_v4 = vmov 1326507024  }
  0x1b   :  { %v705_v41 = vmul.f32 %v43_v33, %v25_v5 }
  0x1c   :  { %v687_v17 = vadd.f32 %v58_v11, %v48_v14  ;;  %v689_v18 = vadd.f32 %v62_v12, %v49_v15  ;;  %v691_v19 = vadd.f32 %v66_v13, %v50_v16 }
  0x1e   :  { %v79_v20 = vand.u32 2147483647, %v687_v17  ;;  %v82_v21 = vand.u32 2139095040, %v687_v17  ;;  %v183_v22 = vand.u32 2147483647, %v689_v18  ;;  %v186_v23 = vand.u32 2139095040, %v689_v18 }
  0x1f   :  { %v290_v29 = vand.u32 2139095040, %v691_v19 }
  0x20   :  { %v83_v25 = vshrl.u32 %v82_v21, 23  ;;  %v86_v26 = vand.u32 8388607, %v79_v20  ;;  %v187_v27 = vshrl.u32 %v186_v23, 23  ;;  %v190_v28 = vand.u32 8388607, %v183_v22 }
  0x21   :  { %v291_v32 = vshrl.u32 %v290_v29, 23 }
  0x22   :  { %v544_v30 = vadd.s32 4294967169, %v83_v25  ;;  %v548_v31 = vadd.s32 4294967169, %v187_v27  ;;  %v87_v35 = vor.u32 8388608, %v86_v26  ;;  %v191_v36 = vor.u32 8388608, %v190_v28 }
  0x23   :  { %v552_v38 = vadd.s32 4294967169, %v291_v32 }
  0x24   :  { %v89_v34 = vadd.s32 1, %v544_v30  ;;  %v193_v37 = vadd.s32 1, %v548_v31  ;;  %v707_v45 = vshll.u32 %v87_v35, 8  ;;  %v709_v47 = vshll.u32 %v191_v36, 8 }
  0x25   :  { %v711_v48 = vadd.s32 1, %v552_v38 }
  0x26   :  { %vm90_vm0 = vcmp.gt.s32.totalorder %v89_v34, 0  ;;  %vm194_vm1 = vcmp.gt.s32.totalorder %v193_v37, 0 }
  0x27   :  { %v91_v40 = vsel %vm90_vm0, %v89_v34, 0  ;;  %v195_v44 = vsel %vm194_vm1, %v193_v37, 0  ;;  %vm298_vm6 = vcmp.gt.s32.totalorder %v711_v48, 0 }
  0x28   :  { %v92_v42 = vshrl.u32 %v91_v40, 5  ;;  %v93_v43 = vand.u32 31, %v91_v40  ;;  %v197_v46 = vand.u32 31, %v195_v44  ;;  %v718_v60 = vshrl.u32 %v195_v44, 5 }
  0x2a   :  { %v94_v49 = vsub.s32 32, %v93_v43  ;;  %v96_v51 = vshll.u32 %v650_v50, %v93_v43  ;;  %v99_v53 = vshll.u32 %v651_v52, %v93_v43  ;;  %v102_v55 = vshll.u32 %v652_v54, %v93_v43 }
  0x2b   :  { %v105_v57 = vshll.u32 %v653_v56, %v93_v43  ;;  %v108_v59 = vshll.u32 %v654_v58, %v93_v43  ;;  %vm111_vm2 = vcmp.lt.s32.totalorder %v92_v42, 1  ;;  %vm112_vm3 = vcmp.lt.s32.totalorder %v92_v42, 2 }
  0x2c   :  { %v95_v61 = vshrl.u32 %v650_v50, %v94_v49  ;;  %v97_v62 = vshrl.u32 %v651_v52, %v94_v49  ;;  %v100_v63 = vshrl.u32 %v652_v54, %v94_v49  ;;  %v103_v2 = vshrl.u32 %v653_v56, %v94_v49 }
  0x2d   :  { %v106_v3 = vshrl.u32 %v654_v58, %v94_v49  ;;  %v109_v5 = vshrl.u32 %v655_v4, %v94_v49  ;;  %vm114_vm4 = vcmp.lt.s32.totalorder %v92_v42, 4  ;;  %v198_v9 = vsub.s32 32, %v197_v46 }
  0x2e   :  { %v98_v6 = vor.u32 %v97_v62, %v96_v51  ;;  %v101_v7 = vor.u32 %v100_v63, %v99_v53  ;;  %v104_v8 = vor.u32 %v103_v2, %v102_v55  ;;  %vm113_vm5 = vcmp.lt.s32.totalorder %v92_v42, 3 }
  0x2f   :  { %v107_v10 = vor.u32 %v106_v3, %v105_v57  ;;  %v110_v11 = vor.u32 %v109_v5, %v108_v59  ;;  %v200_v12 = vshll.u32 %v650_v50, %v197_v46  ;;  %v203_v25 = vshll.u32 %v651_v52, %v197_v46 }
  0x30   :  { %v115_v13 = vsel %vm111_vm2, %v95_v61, %v98_v6  ;;  %v116_v14 = vsel %vm114_vm4, %v104_v8, 2102212464  ;;  %v119_v15 = vsel %vm111_vm2, %v98_v6, %v101_v7  ;;  %v123_v16 = vsel %vm111_vm2, %v101_v7, %v104_v8 }
  0x31   :  { %v117_v21 = vsel %vm113_vm5, %v101_v7, %v116_v14  ;;  %v120_v23 = vsel %vm114_vm4, %v107_v10, 920167782  ;;  %v124_v24 = vsel %vm114_vm4, %v110_v11, 1326507024  ;;  %v199_v28 = vshrl.u32 %v650_v50, %v198_v9 }
  0x32   :  { %v121_v26 = vsel %vm113_vm5, %v104_v8, %v120_v23  ;;  %v125_v27 = vsel %vm113_vm5, %v107_v10, %v124_v24  ;;  %v201_v29 = vshrl.u32 %v651_v52, %v198_v9  ;;  %v118_v30 = vsel %vm112_vm3, %v115_v13, %v117_v21 }
  0x33   :  { %v122_v31 = vsel %vm112_vm3, %v119_v15, %v121_v26  ;;  %v126_v32 = vsel %vm112_vm3, %v123_v16, %v125_v27  ;;  %v204_v33 = vshrl.u32 %v652_v54, %v198_v9  ;;  %v206_v43 = vshll.u32 %v652_v54, %v197_v46 }
  0x34   :  { %v739_v34 = vmul.u32.u64.low %v707_v45, %v126_v32  ;;  %v740_v35 = vmul.u32.u64.high %v707_v45, %v126_v32, %v739_v34  ;;  %v743_v36 = vmul.u32.u64.low %v707_v45, %v122_v31  ;;  %v744_v37 = vmul.u32.u64.high %v707_v45, %v122_v31, %v743_v36 }
  0x35   :  { %v202_v38 = vor.u32 %v201_v29, %v200_v12  ;;  %v205_v40 = vor.u32 %v204_v33, %v203_v25  ;;  %v207_v44 = vshrl.u32 %v653_v56, %v198_v9  ;;  %v209_v42 = vshll.u32 %v653_v56, %v197_v46 }
  0x36   :  { %v210_v49 = vshrl.u32 %v654_v58, %v198_v9  ;;  %v212_v51 = vshll.u32 %v654_v58, %v197_v46  ;;  %v213_v53 = vshrl.u32 %v655_v4, %v198_v9  ;;  %v134_v55 = vmul.u32 %v707_v45, %v118_v30 }
  0x37   :  { %v208_v57 = vor.u32 %v207_v44, %v206_v43  ;;  %vm215_vm7 = vcmp.lt.s32.totalorder %v718_v60, 1  ;;  %vm216_vm8 = vcmp.lt.s32.totalorder %v718_v60, 2  ;;  %vm136_vm9 = vc.u32 %v740_v35, %v743_v36 }
  0x38   :  { %v137_v59 = vadd.s32 1, %v744_v37  ;;  %v211_v61 = vor.u32 %v210_v49, %v209_v42  ;;  %vm217_vm10 = vcmp.lt.s32.totalorder %v718_v60, 3  ;;  %v214_v62 = vor.u32 %v213_v53, %v212_v51 }
  0x39   :  { %vm218_vm11 = vcmp.lt.s32.totalorder %v718_v60, 4  ;;  %v219_v46 = vsel %vm215_vm7, %v199_v28, %v202_v38  ;;  %v223_v63 = vsel %vm215_vm7, %v202_v38, %v205_v40  ;;  %v227_v5 = vsel %vm215_vm7, %v205_v40, %v208_v57 }
  0x3a   :  { %v138_v45 = vsel %vm136_vm9, %v137_v59, %v744_v37  ;;  %v220_v2 = vsel %vm218_vm11, %v208_v57, 2102212464  ;;  %v224_v3 = vsel %vm218_vm11, %v211_v61, 920167782  ;;  %v228_v9 = vsel %vm218_vm11, %v214_v62, 1326507024 }
  0x3b   :  { %v139_v6 = vadd.s32 %v138_v45, %v134_v55  ;;  %v221_v7 = vsel %vm217_vm10, %v205_v40, %v220_v2  ;;  %v225_v8 = vsel %vm217_vm10, %v208_v57, %v224_v3  ;;  %v229_v12 = vsel %vm217_vm10, %v211_v61, %v228_v9 }
  0x3c   :  { %v222_v10 = vsel %vm216_vm8, %v219_v46, %v221_v7  ;;  %v226_v11 = vsel %vm216_vm8, %v223_v63, %v225_v8  ;;  %v299_v13 = vsel %vm298_vm6, %v711_v48, 0  ;;  %v230_v15 = vsel %vm216_vm8, %v227_v5, %v229_v12 }
  0x3d   :  { %v140_v14 = vadd.s32 536870912, %v139_v6  ;;  %v772_v16 = vmul.u32.u64.low %v709_v47, %v226_v11  ;;  %v773_v21 = vmul.u32.u64.high %v709_v47, %v226_v11, %v772_v16  ;;  %v301_v26 = vand.u32 31, %v299_v13 }
  0x3e   :  { %v777_v23 = vmul.u32.u64.low %v709_v47, %v230_v15  ;;  %v778_v24 = vmul.u32.u64.high %v709_v47, %v230_v15, %v777_v23  ;;  %v784_v27 = vadd.f32 %v703_v39, %v705_v41  ;;  %v238_v48 = vmul.u32 %v709_v47, %v222_v10 }
  0x3f   :  { %v780_v25 = vshrl.u32 %v140_v14, 30  ;;  %v287_v60 = vand.u32 2147483647, %v691_v19  ;;  %v241_v28 = vadd.s32 1, %v773_v21  ;;  %v302_v29 = vsub.s32 32, %v301_v26 }
  0x40   :  { %vm240_vm12 = vc.u32 %v778_v24, %v772_v16  ;;  %v300_v39 = vshrl.u32 %v299_v13, 5  ;;  %v394_v41 = vand.u32 2139095040, %v784_v27  ;;  %v304_v47 = vshll.u32 %v650_v50, %v301_v26 }
  0x41   :  { %v142_v30 = vshll.u32 %v780_v25, 30  ;;  %v242_v31 = vsel %vm240_vm12, %v241_v28, %v773_v21  ;;  %v294_v33 = vand.u32 8388607, %v287_v60  ;;  %v305_v34 = vshrl.u32 %v651_v52, %v302_v29 }
  0x42   :  { %v243_v32 = vadd.s32 %v242_v31, %v238_v48  ;;  %v307_v37 = vshll.u32 %v651_v52, %v301_v26  ;;  %v308_v38 = vshrl.u32 %v652_v54, %v302_v29  ;;  %v310_v43 = vshll.u32 %v652_v54, %v301_v26 }
  0x43   :  { %v311_v44 = vshrl.u32 %v653_v56, %v302_v29  ;;  %v313_v42 = vshll.u32 %v653_v56, %v301_v26  ;;  %v803_v49 = vsub.s32 %v139_v6, %v142_v30  ;;  %v314_v51 = vshrl.u32 %v654_v58, %v302_v29 }
  0x44   :  { %v244_v40 = vadd.s32 536870912, %v243_v32  ;;  %v316_v55 = vshll.u32 %v654_v58, %v301_v26  ;;  %v317_v57 = vshrl.u32 %v655_v4, %v302_v29  ;;  %v295_v59 = vor.u32 8388608, %v294_v33 }
  0x45   :  { %v306_v61 = vor.u32 %v305_v34, %v304_v47  ;;  %vm322_vm13 = vcmp.lt.s32.totalorder %v300_v39, 4  ;;  %v395_v62 = vshrl.u32 %v394_v41, 23  ;;  %v309_v63 = vor.u32 %v308_v38, %v307_v37 }
  0x46   :  { %v806_v53 = vshrl.u32 %v244_v40, 30  ;;  %v312_v45 = vor.u32 %v311_v44, %v310_v43  ;;  %v315_v2 = vor.u32 %v314_v51, %v313_v42  ;;  %v145_v3 = vsub.s32 0, %v803_v49 }
  0x47   :  { %v318_v5 = vor.u32 %v317_v57, %v316_v55  ;;  %vm319_vm14 = vcmp.lt.s32.totalorder %v300_v39, 1  ;;  %vm321_vm15 = vcmp.lt.s32.totalorder %v300_v39, 3  ;;  %v303_v7 = vshrl.u32 %v650_v50, %v302_v29 }
  0x48   :  { %v246_v46 = vshll.u32 %v806_v53, 30  ;;  %v328_v8 = vsel %vm322_vm13, %v315_v2, 920167782  ;;  %vm320_vm0 = vcmp.lt.s32.totalorder %v300_v39, 2  ;;  %v556_v9 = vadd.s32 4294967169, %v395_v62 }
  0x49   :  { %v324_v10 = vsel %vm322_vm13, %v312_v45, 2102212464  ;;  %v327_v11 = vsel %vm319_vm14, %v306_v61, %v309_v63  ;;  %v329_v12 = vsel %vm321_vm15, %v312_v45, %v328_v8  ;;  %v331_v13 = vsel %vm319_vm14, %v309_v63, %v312_v45 }
  0x4a   :  { %v812_v6 = vsub.s32 %v243_v32, %v246_v46  ;;  %v545_v14 = vmin.u32 %v145_v3, %v803_v49  ;;  %v332_v21 = vsel %vm322_vm13, %v318_v5, 1326507024  ;;  %v335_v23 = vshll.u32 %v295_v59, 8 }
  0x4b   :  { %v323_v26 = vsel %vm319_vm14, %v303_v7, %v306_v61  ;;  %v333_v48 = vsel %vm321_vm15, %v315_v2, %v332_v21  ;;  %v325_v28 = vsel %vm321_vm15, %v309_v63, %v324_v10  ;;  %v330_v29 = vsel %vm320_vm0, %v327_v11, %v329_v12 }
  0x4c   :  { %v249_v15 = vsub.s32 0, %v812_v6  ;;  %v334_v30 = vsel %vm320_vm0, %v331_v13, %v333_v48  ;;  %v401_v31 = vadd.s32 1, %v556_v9  ;;  %v147_v32 = vclz %v545_v14 }
  0x4d   :  { %v826_v41 = vmul.u32.u64.low %v335_v23, %v334_v30  ;;  %v827_v47 = vmul.u32.u64.high %v335_v23, %v334_v30, %v826_v41  ;;  %v326_v34 = vsel %vm320_vm0, %v323_v26, %v325_v28  ;;  %v391_v43 = vand.u32 2147483647, %v784_v27 }
  0x4e   :  { %v549_v33 = vmin.u32 %v249_v15, %v812_v6  ;;  %v830_v37 = vmul.u32.u64.low %v335_v23, %v330_v29  ;;  %v831_v38 = vmul.u32.u64.high %v335_v23, %v330_v29, %v830_v37  ;;  %vm402_vm1 = vcmp.gt.s32.totalorder %v401_v31, 0 }
  0x4f   :  { %v403_v40 = vsel %vm402_vm1, %v401_v31, 0  ;;  %v546_v42 = vadd.s32 4294967294, %v147_v32  ;;  %v342_v55 = vmul.u32 %v335_v23, %v326_v34  ;;  %v398_v61 = vand.u32 8388607, %v391_v43 }
  0x50   :  { %v405_v44 = vand.u32 31, %v403_v40  ;;  %v251_v51 = vclz %v549_v33  ;;  %vm344_vm2 = vc.u32 %v827_v47, %v830_v37  ;;  %v345_v57 = vadd.s32 1, %v831_v38 }
  0x51   :  { %vm547_vm3 = vcmp.lt.s32.totalorder %v546_v42, 0  ;;  %v404_v7 = vshrl.u32 %v403_v40, 5  ;;  %v399_v9 = vor.u32 8388608, %v398_v61  ;;  %v135_v33 = vadd.s32 %v743_v36, %v740_v35 }
  0x52   :  { %v406_v59 = vsub.s32 32, %v405_v44  ;;  %v346_v39 = vsel %vm344_vm2, %v345_v57, %v831_v38  ;;  %v550_v62 = vadd.s32 4294967294, %v251_v51  ;;  %v408_v63 = vshll.u32 %v650_v50, %v405_v44 }
  0x53   :  { %v347_v46 = vadd.s32 %v346_v39, %v342_v55  ;;  %v411_v2 = vshll.u32 %v651_v52, %v405_v44  ;;  %v417_v8 = vshll.u32 %v653_v56, %v405_v44  ;;  %v414_v10 = vshll.u32 %v652_v54, %v405_v44 }
  0x54   :  { %v409_v45 = vshrl.u32 %v651_v52, %v406_v59  ;;  %v412_v3 = vshrl.u32 %v652_v54, %v406_v59  ;;  %v415_v11 = vshrl.u32 %v653_v56, %v406_v59  ;;  %v150_v12 = vsel %vm547_vm3, 0, %v546_v42 }
  0x55   :  { %v348_v5 = vadd.s32 536870912, %v347_v46  ;;  %vm551_vm4 = vcmp.lt.s32.totalorder %v550_v62, 0  ;;  %v418_v14 = vshrl.u32 %v654_v58, %v406_v59  ;;  %v420_v52 = vshll.u32 %v654_v58, %v405_v44 }
  0x56   :  { %v410_v15 = vor.u32 %v409_v45, %v408_v63  ;;  %v413_v21 = vor.u32 %v412_v3, %v411_v2  ;;  %v421_v23 = vshrl.u32 %v655_v4, %v406_v59  ;;  %vm423_vm5 = vcmp.lt.s32.totalorder %v404_v7, 1 }
  0x57   :  { %v848_v13 = vshrl.u32 %v348_v5, 30  ;;  %v419_v48 = vor.u32 %v418_v14, %v417_v8  ;;  %v155_v28 = vsub.s32 4294967266, %v150_v12  ;;  %v254_v54 = vsel %vm551_vm4, 0, %v550_v62 }
  0x58   :  { %v416_v29 = vor.u32 %v415_v11, %v414_v10  ;;  %v439_v56 = vshll.u32 %v399_v9, 8  ;;  %v407_v31 = vshrl.u32 %v650_v50, %v406_v59  ;;  %vm425_vm6 = vcmp.lt.s32.totalorder %v404_v7, 3 }
  0x59   :  { %v350_v26 = vshll.u32 %v848_v13, 30  ;;  %vm426_vm7 = vcmp.lt.s32.totalorder %v404_v7, 4  ;;  %v422_v32 = vor.u32 %v421_v23, %v420_v52  ;;  %vm424_vm8 = vcmp.lt.s32.totalorder %v404_v7, 2 }
  0x5a   :  { %v428_v58 = vsel %vm426_vm7, %v416_v29, 2102212464  ;;  %v431_v4 = vsel %vm423_vm5, %v410_v15, %v413_v21  ;;  %v432_v34 = vsel %vm426_vm7, %v419_v48, 920167782  ;;  %v151_v38 = vsub.s32 32, %v150_v12 }
  0x5b   :  { %v854_v30 = vsub.s32 %v347_v46, %v350_v26  ;;  %v156_v40 = vadd.s32 127, %v155_v28  ;;  %v259_v44 = vsub.s32 4294967266, %v254_v54  ;;  %v433_v50 = vsel %vm425_vm6, %v416_v29, %v432_v34 }
  0x5c   :  { %v427_v51 = vsel %vm423_vm5, %v407_v31, %v410_v15  ;;  %v429_v55 = vsel %vm425_vm6, %v413_v21, %v428_v58  ;;  %v434_v57 = vsel %vm424_vm8, %v431_v4, %v433_v50  ;;  %v435_v59 = vsel %vm423_vm5, %v413_v21, %v416_v29 }
  0x5d   :  { %v353_v41 = vsub.s32 0, %v854_v30  ;;  %v436_v35 = vsel %vm426_vm7, %v422_v32, 1326507024  ;;  %v870_v36 = vmul.u32.u64.low %v439_v56, %v434_v57  ;;  %v871_v39 = vmul.u32.u64.high %v439_v56, %v434_v57, %v870_v36 }
  0x5e   :  { %v239_v61 = vadd.s32 %v772_v16, %v778_v24  ;;  %v255_v62 = vsub.s32 32, %v254_v54  ;;  %v152_v63 = vshll.u32 %v803_v49, %v150_v12  ;;  %v153_v45 = vshrl.u32 %v135_v33, %v151_v38 }
  0x5f   :  { %v553_v42 = vmin.u32 %v353_v41, %v854_v30  ;;  %v260_v2 = vadd.s32 127, %v259_v44  ;;  %v437_v3 = vsel %vm425_vm6, %v419_v48, %v436_v35  ;;  %v157_v5 = vshll.u32 %v156_v40, 23 }
  0x60   :  { %v430_v9 = vsel %vm424_vm8, %v427_v51, %v429_v55  ;;  %v438_v10 = vsel %vm424_vm8, %v435_v59, %v437_v3  ;;  %v256_v15 = vshll.u32 %v812_v6, %v254_v54  ;;  %v257_v16 = vshrl.u32 %v239_v61, %v255_v62 }
  0x61   :  { %v355_v46 = vclz %v553_v42  ;;  %v880_v11 = vmul.u32.u64.low %v439_v56, %v438_v10  ;;  %v881_v14 = vmul.u32.u64.high %v439_v56, %v438_v10, %v880_v11  ;;  %v449_v24 = vadd.s32 1, %v871_v39 }
  0x62   :  { %v261_v49 = vshll.u32 %v260_v2, 23  ;;  %v343_v12 = vadd.s32 %v830_v37, %v827_v47  ;;  %v446_v52 = vmul.u32 %v439_v56, %v430_v9  ;;  %v154_v23 = vor.u32 %v153_v45, %v152_v63 }
  0x63   :  { %v554_v8 = vadd.s32 4294967294, %v355_v46  ;;  %v158_v26 = vor.u32 4788187, %v157_v5  ;;  %vm448_vm10 = vc.u32 %v881_v14, %v870_v36  ;;  %v258_v28 = vor.u32 %v257_v16, %v256_v15 }
  0x64   :  { %v450_v6 = vsel %vm448_vm10, %v449_v24, %v871_v39  ;;  %v262_v54 = vor.u32 4788187, %v261_v49  ;;  %v161_v47 = vcvt.s32.f32 %v154_v23  ;;  %vm81_vm11 = vcmp.lt.s32.totalorder %v687_v17, 0 }
  0x65   :  { %vm555_vm9 = vcmp.lt.s32.totalorder %v554_v8, 0  ;;  %v451_v58 = vadd.s32 %v450_v6, %v446_v52  ;;  %v159_v4 = vand.u32 2147483647, %v158_v26  ;;  %v265_v33 = vcvt.s32.f32 %v258_v28 }
  0x66   :  { %v358_v21 = vsel %vm555_vm9, 0, %v554_v8  ;;  %v263_v41 = vand.u32 2147483647, %v262_v54  ;;  %vm897_vm12 = vcmp.le.f32.partialorder %v79_v20, 0.7853982  ;;  %vm185_vm13 = vcmp.lt.s32.totalorder %v689_v18, 0 }
  0x67   :  { %v359_v48 = vsub.s32 32, %v358_v21  ;;  %v363_v7 = vsub.s32 4294967266, %v358_v21  ;;  %v360_v31 = vshll.u32 %v854_v30, %v358_v21  ;;  %v452_v56 = vadd.s32 536870912, %v451_v58 }
  0x68   :  { %v162_v44 = vmul.f32 %v161_v47, %v159_v4  ;;  %v266_v42 = vmul.f32 %v265_v33, %v263_v41  ;;  %v165_v63 = vsub.s32 4, %v780_v25  ;;  %vm907_vm14 = vcmp.le.f32.partialorder %v183_v22, 0.7853982 }
  0x69   :  { %v364_v29 = vadd.s32 127, %v363_v7  ;;  %v361_v32 = vshrl.u32 %v343_v12, %v359_v48  ;;  %v891_v40 = vshrl.u32 %v452_v56, 30  ;;  %vm289_vm15 = vcmp.lt.s32.totalorder %v691_v19, 0 }
  0x6a   :  { %v163_v30 = vxor.u32 2147483648, %v162_v44  ;;  %v267_v35 = vxor.u32 2147483648, %v266_v42  ;;  %v166_v9 = vsel %vm81_vm11, %v165_v63, %v780_v25  ;;  %vm922_vm0 = vcmp.le.f32.partialorder %v287_v60, 0.7853982 }
  0x6b   :  { %v365_v37 = vshll.u32 %v364_v29, 23  ;;  %v362_v34 = vor.u32 %v361_v32, %v360_v31  ;;  %v454_v50 = vshll.u32 %v891_v40, 30  ;;  %v447_v10 = vadd.s32 %v870_v36, %v881_v14 }
  0x6c   :  { %v164_v46 = vsel %vm81_vm11, %v163_v30, %v162_v44  ;;  %v268_v3 = vsel %vm185_vm13, %v267_v35, %v266_v42  ;;  %v269_v11 = vsub.s32 4, %v806_v53  ;;  %v168_v12 = vsel %vm897_vm12, 0, %v166_v9 }
  0x6d   :  { %v366_v38 = vor.u32 4788187, %v365_v37  ;;  %v369_v55 = vcvt.s32.f32 %v362_v34  ;;  %v455_v57 = vsub.s32 %v451_v58, %v454_v50  ;;  %v167_v20 = vsel %vm897_vm12, %v687_v17, %v164_v46 }
  0x6e   :  { %585 = vcosq.f32 %v167_v20  ;;  %v271_v15 = vsel %vm907_vm14, %v689_v18, %v268_v3  ;;  %v270_v21 = vsel %vm185_vm13, %v269_v11, %v806_v53  ;;  %v373_v52 = vsub.s32 4, %v848_v13 }
  0x6f   :  { %v367_v51 = vand.u32 2147483647, %v366_v38  ;;  %v457_v59 = vsub.s32 0, %v455_v57  ;;  %587 = vsinq.f32 %v167_v20  ;;  %v172_v7 = vadd.s32 3, %v168_v12 }
  0x70   :  { %589 = vcosq.f32 %v271_v15  ;;  %v272_v28 = vsel %vm907_vm14, 0, %v270_v21  ;;  %v374_v53 = vsel %vm289_vm15, %v373_v52, %v848_v13  ;;  %v477_v31 = vsub.s32 4, %v891_v40 }
  0x71   :  { %v370_v39 = vmul.f32 %v369_v55, %v367_v51  ;;  %v557_v61 = vmin.u32 %v457_v59, %v455_v57  ;;  %591 = vsinq.f32 %v271_v15  ;;  %v276_v58 = vadd.s32 3, %v272_v28 }
  0x72   :  { %v173_v4 = vand.u32 3, %v172_v7  ;;  %v376_v47 = vsel %vm922_vm0, 0, %v374_v53  ;;  %vm393_vm2 = vcmp.lt.s32.totalorder %v784_v27, 0  ;;  %vm954_vm3 = vcmp.le.f32.partialorder %v391_v43, 0.7853982 }
  0x73   :  { %v459_v45 = vclz %v557_v61  ;;  %v371_v5 = vxor.u32 2147483648, %v370_v39  ;;  %v478_v34 = vsel %vm393_vm2, %v477_v31, %v891_v40  ;;  %v277_v44 = vand.u32 3, %v276_v58 }
  0x74   :  { %v380_v50 = vadd.s32 3, %v376_v47  ;;  %vm175_vm4 = vcmp.eq.s32.totalorder %v173_v4, 0  ;;  %v480_v43 = vsel %vm954_vm3, 0, %v478_v34  ;;  %vm178_vm5 = vcmp.eq.s32.totalorder %v173_v4, 2 }
  0x75   :  { %v558_v8 = vadd.s32 4294967294, %v459_v45  ;;  %v372_v25 = vsel %vm289_vm15, %v371_v5, %v370_v39  ;;  %vm279_vm6 = vcmp.eq.s32.totalorder %v277_v44, 0  ;;  %vm282_vm7 = vcmp.eq.s32.totalorder %v277_v44, 2 }
  0x76   :  { %v375_v23 = vsel %vm922_vm0, %v691_v19, %v372_v25  ;;  %v381_v39 = vand.u32 3, %v380_v50  ;;  %v484_v61 = vadd.s32 3, %v480_v43  ;;  %vm174_vm8 = vcmp.lt.s32.totalorder %v173_v4, 2 }
  0x77   :  { %vm559_vm1 = vcmp.lt.s32.totalorder %v558_v8, 0  ;;  %593 = vcosq.f32 %v375_v23  ;;  %vm278_vm9 = vcmp.lt.s32.totalorder %v277_v44, 2  ;;  %v656_v3 = vmov 1966171168  }
  0x78   :  { %v462_v16 = vsel %vm559_vm1, 0, %v558_v8  ;;  %595 = vsinq.f32 %v375_v23  ;;  %v586_v32 = vpop.eup %585  ;;  %vm383_vm10 = vcmp.eq.s32.totalorder %v381_v39, 0  ;;  %vm386_vm11 = vcmp.eq.s32.totalorder %v381_v39, 2 }
  0x79   :  { %v463_v24 = vsub.s32 32, %v462_v16  ;;  %v464_v60 = vshll.u32 %v455_v57, %v462_v16  ;;  %v467_v49 = vsub.s32 4294967266, %v462_v16  ;;  %v588_v56 = vpop.eup %587  ;;  %v179_v55 = vxor.u32 2147483648, %v586_v32 }
  0x7a   :  { %v590_v33 = vpop.eup %589  ;;  %v176_v51 = vxor.u32 2147483648, %v588_v56  ;;  %v502_v5 = vunpack.c.l.s4 %v656_v3  ;;  %v485_v8 = vand.u32 3, %v484_v61  ;;  %vm171_vm12 = vweird.f32 %v687_v17 }
  0x7b   :  { %v465_v36 = vshrl.u32 %v447_v10, %v463_v24  ;;  %v468_v14 = vadd.s32 127, %v467_v49  ;;  %v592_v38 = vpop.eup %591  ;;  %v283_v35 = vxor.u32 2147483648, %v590_v33  ;;  %v180_v46 = vsel %vm178_vm5, %v179_v55, %v588_v56 }
  0x7c   :  { %v280_v59 = vxor.u32 2147483648, %v592_v38  ;;  %v177_v62 = vsel %vm175_vm4, %v586_v32, %v176_v51  ;;  %vm275_vm13 = vweird.f32 %v689_v18  ;;  %vm382_vm14 = vcmp.lt.s32.totalorder %v381_v39, 2 }
  0x7d   :  { %v466_v26 = vor.u32 %v465_v36, %v464_v60  ;;  %v469_v48 = vshll.u32 %v468_v14, 23  ;;  %v284_v45 = vsel %vm282_vm7, %v283_v35, %v592_v38  ;;  %v181_v9 = vsel %vm174_vm8, %v177_v62, %v180_v46 }
  0x7e   :  { %v281_v63 = vsel %vm279_vm6, %v590_v33, %v280_v59  ;;  %v503_v15 = vunpack.c.0.s8 %v502_v5  ;;  %v182_v25 = vsel %vm171_vm12, nan, %v181_v9  ;;  %vm490_vm15 = vcmp.eq.s32.totalorder %v485_v8, 2 }
  0x7f   :  { %v470_v29 = vor.u32 4788187, %v469_v48  ;;  %v473_v6 = vcvt.s32.f32 %v466_v26  ;;  %v285_v22 = vsel %vm278_vm9, %v281_v63, %v284_v45  ;;  %vm379_vm0 = vweird.f32 %v691_v19 }
  0x80   :  { %v286_v24 = vsel %vm275_vm13, nan, %v285_v22  ;;  %vm487_vm1 = vcmp.eq.s32.totalorder %v485_v8, 0  ;;  %v506_v14 = vsub.s32 %v503_v15, %v681_v1  ;;  %vm526_vm4 = vcmp.lt.s32.totalorder %v21_v0, 512 }
  0x81   :  { %v471_v54 = vand.u32 2147483647, %v470_v29  ;;  %v594_v30 = vpop.eup %593  ;;  %v499_v36 = vcombine.low %v182_v25, %v286_v24 }
  0x82   :  { %v596_v40 = vpop.eup %595  ;;  %v387_v20 = vxor.u32 2147483648, %v594_v30 }
  0x83   :  { %v474_v37 = vmul.f32 %v473_v6, %v471_v54  ;;  %v384_v2 = vxor.u32 2147483648, %v596_v40  ;;  %v507_v7 = vrot.slane %v499_v36, %v506_v14 }
  0x84   :  { %v388_v11 = vsel %vm386_vm11, %v387_v20, %v596_v40 }
  0x85   :  { %v475_v13 = vxor.u32 2147483648, %v474_v37  ;;  %v385_v10 = vsel %vm383_vm10, %v594_v30, %v384_v2 }
  0x86   :  { %v389_v49 = vsel %vm382_vm14, %v385_v10, %v388_v11 }
  0x87   :  { %v476_v42 = vsel %vm393_vm2, %v475_v13, %v474_v37  ;;  %vm486_vm2 = vcmp.lt.s32.totalorder %v485_v8, 2  ;;  %v390_v21 = vsel %vm379_vm0, nan, %v389_v49 }
  0x88   :  { %v479_v57 = vsel %vm954_vm3, %v784_v27, %v476_v42  ;;  %vm483_vm3 = vweird.f32 %v784_v27 }
  0x89   :  { %597 = vcosq.f32 %v479_v57 }
  0x8a   :  { %599 = vsinq.f32 %v479_v57 }
  0x93   :  { %v598_v16 = vpop.eup %597 }
  0x94   :  { %v600_v60 = vpop.eup %599  ;;  %v491_v12 = vxor.u32 2147483648, %v598_v16 }
  0x95   :  { %v488_v17 = vxor.u32 2147483648, %v600_v60 }
  0x96   :  { %v492_v18 = vsel %vm490_vm15, %v491_v12, %v600_v60 }
  0x97   :  { %v489_v52 = vsel %vm487_vm1, %v598_v16, %v488_v17 }
  0x98   :  { %v493_v23 = vsel %vm486_vm2, %v489_v52, %v492_v18 }
  0x99   :  { %v494_v26 = vsel %vm483_vm3, nan, %v493_v23 }
  0x9a   :  { %v500_v48 = vcombine.low %v390_v21, %v494_v26 }
  0x9c   :  { %v514_v28 = vrot.slane %v500_v48, %v506_v14 }
  0x9e   :  { %v515_v19 = vcombine.low %v507_v7, %v514_v28 }
  0xa0   :  { %v522_v29 = vrot.slane %v515_v19, %v506_v14 }
  0xa2   :  { %528 = vst.msk [vmem:[#allocation5] sm:$0xf] %vm526_vm4, %v522_v29 }
  0xa3   :  { %634 = shalt.err (!%p631_p12)
}
  0xa4   :  { %s635_s22 = scalar_lea.hbm %s984_s1, 64 }
  0xa5   :  { %p636_p13 = scmp.ne.s32.totalorder %s984_s1, %s635_s22  ;;  %p639_p0 = scmp.lt.u32.totalorder %s635_s22, %s984_s1 }
  0xa7   :  { %p641_p1 = pnand %p639_p0, %p636_p13 }
  0xa9   :  { %644 = shalt.err (!%p641_p1)
}
  0xaa   :  { %538 = dma.vmem_to_hbm [thread:$0]  %s536_s18, 64, %s984_s1, [#allocation4]  }
  0xab   :  { %647 = dma.done.wait [#allocation4], 64  }
  0xac   :  { %648 = vsyncadd [#allocation4], 4294967232 }
  0xad   :  { %542 = vsyncpa [#allocation3], 1 }
  0xae   :  { %543 = vsyncpa [#allocation4], 1 }

</bundles_post_ra>
